<compile_context>
chip_gen: v5e
topology: v5e:2x2
jax: 0.10.0
libtpu: 0.0.40
codegen_flags: <defaults>
</compile_context>

<pallas_src>
import jax
import jax.numpy as jnp
from jax.experimental import pallas as pl
from jax.experimental.pallas import tpu as pltpu


def _round_up(x, m):
    return ((x + m - 1) // m) * m


def _head_kernel(x_ref, w1_ref, b1_ref, w2_ref, b2_ref, o_ref):
    # x tile [TB, H]: cast to bf16 for the MXU (every generation's MXU is
    # bf16-native; the f32 path is emulated with multiple passes).
    x = x_ref[...].astype(jnp.bfloat16)
    h = jnp.dot(x, w1_ref[...], preferred_element_type=jnp.float32)
    h = h + b1_ref[...]                      # bias in f32
    h = jnp.tanh(h)                          # f32 tanh on the EUP
    h = h.astype(w2_ref.dtype)               # bf16 for the second matmul
    out = jnp.dot(h, w2_ref[...], preferred_element_type=jnp.float32)
    out = out + b2_ref[...]                  # [TB, L_pad], lane-dense
    o_ref[...] = out.astype(o_ref.dtype)


def prepare_head_params(w1, b1, w2, b2):
    """One-time parameter prep: bf16 weights + lane-dense (128-padded) out_proj.

    w1: [H, H], b1: [H] or [1, H], w2: [H, L], b2: [L] or [1, L].
    Weights are stored [in, out] (transposed vs torch's [out, in]) so the
    kernel computes x @ W + b directly.
    """
    H = w1.shape[0]
    L = w2.shape[-1]
    L_pad = _round_up(max(L, 1), 128)
    b1 = jnp.asarray(b1, jnp.float32).reshape(1, H)
    b2 = jnp.asarray(b2, jnp.float32).reshape(1, L)
    if L_pad != L:
        w2 = jnp.pad(w2, ((0, 0), (0, L_pad - L)))
        b2 = jnp.pad(b2, ((0, 0), (0, L_pad - L)))
    return dict(
        w1=jnp.asarray(w1, jnp.bfloat16),
        b1=b1,
        w2=jnp.asarray(w2, jnp.bfloat16),
        b2=b2,
        num_labels=L,
    )


def cl_classification_head(features, params, *, block_b=1024):
    """features: [B, H]; params from prepare_head_params. Returns [B, L]."""
    B, H = features.shape
    w1, b1, w2, b2 = params["w1"], params["b1"], params["w2"], params["b2"]
    L = params["num_labels"]
    L_pad = w2.shape[1]

    # Batch tile: 8-sublane aligned, large enough to amortize the ~0.35us
    # per-grid-step overhead. No batch pad: grid = cdiv(B, TB) and Pallas
    # masks the trailing partial block's output stores.
    TB = min(block_b, _round_up(B, 8))
    # Give the batch grid >= 2 steps when possible so both v7x TensorCores
    # get work (negligible extra grid-step cost on single-TC v5e/v6e).
    if B > 8 and pl.cdiv(B, TB) < 2:
        TB = max(_round_up(pl.cdiv(B, 2), 8), 8)
    grid = (pl.cdiv(B, TB),)

    # Footprint-derived VMEM limit with ~50% headroom (instead of a blanket
    # constant); floor keeps compiler internal scratch comfortable, cap stays
    # below v5e/v6e physical VMEM.
    x_bytes = features.dtype.itemsize
    w_bytes = w1.dtype.itemsize
    est_vmem = (
        2 * TB * H * x_bytes                      # x tile, double-buffered
        + (H * H + H * L_pad) * w_bytes           # w1 + w2, single-buffered
        + (H + L_pad) * 4                         # b1 + b2 (f32)
        + 2 * TB * L_pad * x_bytes                # out tile, double-buffered
        + TB * H * (4 + w_bytes)                  # f32 + bf16 [TB,H] intermediates
    )
    vmem_limit = int(min(max(est_vmem * 1.5, 16 * 1024 * 1024),
                         96 * 1024 * 1024))

    resident = dict(pipeline_mode=pl.Buffered(1))  # constant index_map: nothing to prefetch

    out = pl.pallas_call(
        _head_kernel,
        out_shape=jax.ShapeDtypeStruct((B, L_pad), features.dtype),
        grid_spec=pltpu.PrefetchScalarGridSpec(
            num_scalar_prefetch=0,
            grid=grid,
            in_specs=[
                pl.BlockSpec((TB, H), lambda i: (i, 0)),                  # x: tiled over batch
                pl.BlockSpec((H, H), lambda i: (0, 0), **resident),       # w1: resident
                pl.BlockSpec((1, H), lambda i: (0, 0), **resident),       # b1: resident
                pl.BlockSpec((H, L_pad), lambda i: (0, 0), **resident),   # w2 (padded): resident
                pl.BlockSpec((1, L_pad), lambda i: (0, 0), **resident),   # b2 (padded): resident
            ],
            out_specs=pl.BlockSpec((TB, L_pad), lambda i: (i, 0)),
        ),
        compiler_params=pltpu.CompilerParams(
            dimension_semantics=("parallel",),   # shard batch grid across TCs (v7x)
            vmem_limit_bytes=vmem_limit,
        ),
    )(features, w1, b1, w2, b2)

    return out[:, :L]


if __name__ == "__main__":
    batch = 8
    hidden = 32
    num_labels = 4

    key = jax.random.PRNGKey(0)
    k_x, k_w1, k_b1, k_w2, k_b2 = jax.random.split(key, 5)

    # Deterministic synthetic parameters (uniform like torch Linear default range).
    bound = 1.0 / (hidden ** 0.5)
    features = jax.random.normal(k_x, (batch, hidden), dtype=jnp.float32)
    w1 = jax.random.uniform(k_w1, (hidden, hidden), jnp.float32, -bound, bound)
    b1 = jax.random.uniform(k_b1, (hidden,), jnp.float32, -bound, bound)
    w2 = jax.random.uniform(k_w2, (hidden, num_labels), jnp.float32, -bound, bound)
    b2 = jax.random.uniform(k_b2, (num_labels,), jnp.float32, -bound, bound)

    params = prepare_head_params(w1, b1, w2, b2)
    out = cl_classification_head(features, params)
    out = jax.block_until_ready(out)

    # Pure-JAX f32 reference (eval-mode dropout == identity). bf16 MXU operands
    # give ~1e-2-level relative deviation; f32 accumulation keeps it benign.
    ref = jnp.tanh(features @ w1 + b1) @ w2 + b2
    assert out.shape == (batch, num_labels)
    max_err = float(jnp.max(jnp.abs(out - ref)))
    assert jnp.allclose(out, ref, atol=3e-2, rtol=3e-2), f"max_abs_err={max_err}"

    print("KERNEL_OK")
</pallas_src>

<mosaic_0001>
module attributes {stable_mosaic.version = 11 : i64} {
  func.func @_head_kernel(%arg0: i32, %arg1: memref<8x32xf32, #tpu.memory_space<vmem>>, %arg2: memref<32x32xbf16, #tpu.memory_space<vmem>>, %arg3: memref<1x32xf32, #tpu.memory_space<vmem>>, %arg4: memref<32x128xbf16, #tpu.memory_space<vmem>>, %arg5: memref<1x128xf32, #tpu.memory_space<vmem>>, %arg6: memref<8x128xf32, #tpu.memory_space<vmem>>) attributes {dimension_semantics = [#tpu.dimension_semantics<parallel>], iteration_bounds = array<i64: 1>, scalar_prefetch = 0 : i64, scratch_operands = 0 : i64, tpu.core_type = #tpu.core_type<tc>, window_params = [{transform_indices = @transform_0, window_bounds = array<i64: 8, 32>}, {pipeline_mode = #tpu.pipeline_mode<synchronous>, transform_indices = @transform_1, window_bounds = array<i64: 32, 32>}, {pipeline_mode = #tpu.pipeline_mode<synchronous>, transform_indices = @transform_2, window_bounds = array<i64: 1, 32>}, {pipeline_mode = #tpu.pipeline_mode<synchronous>, transform_indices = @transform_3, window_bounds = array<i64: 32, 128>}, {pipeline_mode = #tpu.pipeline_mode<synchronous>, transform_indices = @transform_4, window_bounds = array<i64: 1, 128>}, {transform_indices = @transform_5, window_bounds = array<i64: 8, 128>}]} {
    %c0 = arith.constant 0 : index
    %c0_0 = arith.constant 0 : index
    %0 = vector.load %arg1[%c0, %c0_0] : memref<8x32xf32, #tpu.memory_space<vmem>>, vector<8x32xf32>
    %1 = arith.truncf %0 : vector<8x32xf32> to vector<8x32xbf16>
    %c0_1 = arith.constant 0 : index
    %c0_2 = arith.constant 0 : index
    %2 = vector.load %arg2[%c0_1, %c0_2] : memref<32x32xbf16, #tpu.memory_space<vmem>>, vector<32x32xbf16>
    %cst = arith.constant dense<0.000000e+00> : vector<8x32xf32>
    %3 = tpu.matmul %1, %2, %cst {dimension_numbers = #tpu.dot_dimension_numbers<[1], [0], [0], [1], [0, 0, 1, 1], [], []>} : vector<8x32xbf16>, vector<32x32xbf16>, vector<8x32xf32> -> vector<8x32xf32>
    %c0_3 = arith.constant 0 : index
    %c0_4 = arith.constant 0 : index
    %4 = vector.load %arg3[%c0_3, %c0_4] : memref<1x32xf32, #tpu.memory_space<vmem>>, vector<1x32xf32>
    %5 = vector.broadcast %4 : vector<1x32xf32> to vector<8x32xf32>
    %6 = arith.addf %3, %5 : vector<8x32xf32>
    %7 = math.tanh %6 : vector<8x32xf32>
    %8 = arith.truncf %7 : vector<8x32xf32> to vector<8x32xbf16>
    %c0_5 = arith.constant 0 : index
    %c0_6 = arith.constant 0 : index
    %9 = vector.load %arg4[%c0_5, %c0_6] : memref<32x128xbf16, #tpu.memory_space<vmem>>, vector<32x128xbf16>
    %cst_7 = arith.constant dense<0.000000e+00> : vector<8x128xf32>
    %10 = tpu.matmul %8, %9, %cst_7 {dimension_numbers = #tpu.dot_dimension_numbers<[1], [0], [0], [1], [0, 0, 1, 1], [], []>} : vector<8x32xbf16>, vector<32x128xbf16>, vector<8x128xf32> -> vector<8x128xf32>
    %c0_8 = arith.constant 0 : index
    %c0_9 = arith.constant 0 : index
    %11 = vector.load %arg5[%c0_8, %c0_9] : memref<1x128xf32, #tpu.memory_space<vmem>>, vector<1x128xf32>
    %12 = vector.broadcast %11 : vector<1x128xf32> to vector<8x128xf32>
    %13 = arith.addf %10, %12 : vector<8x128xf32>
    %c0_10 = arith.constant 0 : index
    %c0_11 = arith.constant 0 : index
    %14 = vector.load %arg6[%c0_10, %c0_11] : memref<8x128xf32, #tpu.memory_space<vmem>>, vector<8x128xf32>
    tpu.vector_store %arg6[%c0_10, %c0_11], %13 {strides = array<i32>} : memref<8x128xf32, #tpu.memory_space<vmem>>, vector<8x128xf32>,
    return
  }
  func.func @transform_0(%arg0: i32) -> (i32, i32) {
    %c0_i32 = arith.constant 0 : i32
    %c0_i32_0 = arith.constant 0 : i32
    return %arg0, %c0_i32 : i32, i32
  }
  func.func @transform_1(%arg0: i32) -> (i32, i32) {
    %c0_i32 = arith.constant 0 : i32
    %c0_i32_0 = arith.constant 0 : i32
    %c0_i32_1 = arith.constant 0 : i32
    return %c0_i32, %c0_i32_0 : i32, i32
  }
  func.func @transform_2(%arg0: i32) -> (i32, i32) {
    %c0_i32 = arith.constant 0 : i32
    %c0_i32_0 = arith.constant 0 : i32
    %c0_i32_1 = arith.constant 0 : i32
    return %c0_i32, %c0_i32_0 : i32, i32
  }
  func.func @transform_3(%arg0: i32) -> (i32, i32) {
    %c0_i32 = arith.constant 0 : i32
    %c0_i32_0 = arith.constant 0 : i32
    %c0_i32_1 = arith.constant 0 : i32
    return %c0_i32, %c0_i32_0 : i32, i32
  }
  func.func @transform_4(%arg0: i32) -> (i32, i32) {
    %c0_i32 = arith.constant 0 : i32
    %c0_i32_0 = arith.constant 0 : i32
    %c0_i32_1 = arith.constant 0 : i32
    return %c0_i32, %c0_i32_0 : i32, i32
  }
  func.func @transform_5(%arg0: i32) -> (i32, i32) {
    %c0_i32 = arith.constant 0 : i32
    %c0_i32_0 = arith.constant 0 : i32
    return %arg0, %c0_i32 : i32, i32
  }
}

</mosaic_0001>

<bundles_post_ra>
// kernel: tpu_custom_call.1
= control target key start
LH: loop header
LB: loop body
LE: loop exit
PB: predicated region body
PF: predicated region fallthrough
CT: control target
= control target key end

     0   :  { %10 = vsyncpa [#allocation3], 0  ;;  %s351_s0 = inlined_call_operand.hbm [shape: f32[8,32], index: 0, kind: input, shape index: {}]   ;;  %s352_s1 = inlined_call_operand.hbm [shape: bf16[32,32], index: 1, kind: input, shape index: {}]   ;;  %s353_s2 = inlined_call_operand.vmem [shape: f32[1,32], index: 2, kind: input, shape index: {}]   ;;  %s354_s3 = inlined_call_operand.hbm [shape: bf16[32,128], index: 3, kind: input, shape index: {}]   ;;  %s355_s4 = inlined_call_operand.vmem [shape: f32[1,128], index: 4, kind: input, shape index: {}]   ;;  %s356_s5 = inlined_call_operand.hbm [shape: f32[8,128], index: 5, kind: output, shape index: {}]  }
   0x1   :  { %11 = vsyncpa [#allocation6], 0  ;;  %s28_s20 = sshll.u32 %s352_s1, 4  ;;  %s29_s20 = int_to_ptr.hbm [resolvable:$true] %s28_s20 }
   0x2   :  { %12 = vsyncpa [#allocation4], 0  ;;  %s297_s21 = smov [#allocation5]   ;;  %s18_s25 = sshll.u32 %s351_s0, 4  ;;  %s19_s25 = int_to_ptr.hbm [resolvable:$true] %s18_s25 }
   0x3   :  { %s30_s22 = sshll.u32 %s297_s21, 4  ;;  %s298_s26 = smov 64   ;;  %s31_s22 = int_to_ptr.vmem [resolvable:$true] %s30_s22 }
   0x4   :  { %s299_s27 = smov 4   ;;  %s300_s28 = smov [#allocation2]  }
   0x5   :  { %36 = dma.hbm_to_vmem [thread:$0]  %s29_s20, 256, %s31_s22, [#allocation6], %s298_s26, %s298_s26, %s299_s27  }
   0x6   :  { %s20_s29 = sshll.u32 %s300_s28, 4  ;;  %s43_s7 = sshll.u32 %s354_s3, 4  ;;  %s21_s29 = int_to_ptr.vmem [resolvable:$true] %s20_s29  ;;  %s44_s7 = int_to_ptr.hbm [resolvable:$true] %s43_s7 }
   0x7   :  { %23 = dma.hbm_to_vmem [thread:$0]  %s19_s25, 128, %s21_s29, [#allocation3]  }
   0x8   :  { %s301_s1 = smov [#allocation7]  }
   0x9   :  { %s45_s8 = sshll.u32 %s301_s1, 4  ;;  %s46_s8 = int_to_ptr.vmem [resolvable:$true] %s45_s8 }
   0xa   :  { %51 = dma.hbm_to_vmem [thread:$0]  %s44_s7, 256, %s46_s8, [#allocation6], %s298_s26, %s298_s26, %s299_s27  }
   0xb   :  { %291 = dma.done.wait [#allocation3], 128  }
   0xc   :  { %292 = vsyncadd [#allocation3], 4294967168 }
   0xd   :  { %293 = dma.done.wait [#allocation6], 512  }
   0xe   :  { %294 = vsyncadd [#allocation6], 4294966784  ;;  %v182_v0 = vld [vmem:[#allocation5 + $0x8] sm:$0xff]  ;;  %v181_v1 = vld [vmem:[#allocation5] sm:$0xff]  ;;  %vm89_vm0 = vcmask 261120   ;;  %s302_s11 = smov [#allocation8]  }
   0xf   :  { %99 = vmatpush.bf16.msra.mxu0 %v182_v0  ;;  %v67_v2 = vld [vmem:[#allocation2] sm:$0xff]  ;;  %v183_v5 = vld [vmem:[#allocation7] sm:$0xff]  ;;  %s150_s12 = sshll.u32 %s302_s11, 4  ;;  %s152_s15 = sshll.u32 %s356_s5, 4  ;;  %s151_s12 = int_to_ptr.vmem [resolvable:$true] %s150_s12  ;;  %s153_s15 = int_to_ptr.hbm [resolvable:$true] %s152_s15 }
  0x10   :  { %v68_v3 = vpack.c.bf16 %v67_v2, %v67_v2  ;;  %v184_v4 = vld [vmem:[#allocation7 + $0x8] sm:$0xff] }
  0x11   :  { %137 = vmatpush.bf16.msra.mxu1 %v184_v4  ;;  %v191_v6 = vld [vmem:[%s353_s2] ss:$0 sm:$0xff] }
  0x12   :  { %v192_v12 = vld [vmem:[%s355_s4] ss:$0 sm:$0xff] }
  0x13   :  { %100 = vmatpush.bf16.msra.mxu0 %v181_v1 }
  0x15   :  { %138 = vmatpush.bf16.msra.mxu1 %v183_v5 }
  0x16   :  { %171 = vmatmul.msk.bf16.vlgmr.msra.gmra.mxu0 %vm89_vm0, %v68_v3 }
  0x93   :  { %v102_v7 = vpop.f32.mrf.mxu0 }
  0x94   :  { %v103_v8 = vadd.f32 %v191_v6, %v102_v7 }
  0x96   :  { %193 = vtanh.f32 %v103_v8 }
  0x9b   :  { %v104_v9 = vpop.f32.mrf.mxu0 }
  0x9c   :  { %v194_v10 = vpop.eup %193 }
  0x9d   :  { %v107_v11 = vpack.c.bf16 %v194_v10, %v194_v10 }
  0x9f   :  { %180 = vmatmul.msk.bf16.vlgmr.msra.gmra.mxu1 %vm89_vm0, %v107_v11 }
 0x11c   :  { %v140_v13 = vpop.f32.mrf.mxu1 }
 0x11d   :  { %v141_v14 = vadd.f32 %v192_v12, %v140_v13 }
 0x11f   :  { %144 = vst [vmem:[#allocation8] sm:$0xff] %v141_v14 }
 0x120   :  { %155 = dma.vmem_to_hbm [thread:$0]  %s151_s12, 128, %s153_s15, [#allocation4]  }
 0x124   :  { %v142_v15 = vpop.f32.mrf.mxu1 }
 0x125   :  { %295 = dma.done.wait [#allocation4], 128  }
 0x126   :  { %296 = vsyncadd [#allocation4], 4294967168 }
 0x127   :  { %160 = vsyncpa [#allocation3], 1 }
 0x128   :  { %161 = vsyncpa [#allocation6], 1 }
 0x129   :  { %162 = vsyncpa [#allocation4], 1 }

</bundles_post_ra>
